<compile_context>
chip_gen: v7x
topology: tpu7x:2x2x1
jax: 0.10.0
libtpu: 0.0.40
codegen_flags: <defaults>
</compile_context>

<pallas_src>
import jax
import jax.numpy as jnp
from jax.experimental import pallas as pl
from jax.experimental.pallas import tpu as pltpu

_NCORES = 2                    # v7x: 2 TCs/chip; harmless extra step on v5e/v6e
_CHUNKS_PER_CORE = 4           # up to 8 concurrent DMAs chip-wide
_MIN_CHUNK_BYTES = 512 * 1024  # don't split below ~0.5 MiB per piece


def _split(start, size, parts):
    """Split [start, start+size) into <= `parts` non-empty contiguous pieces."""
    parts = max(1, min(parts, size))
    base, rem = divmod(size, parts)
    pieces, s = [], start
    for i in range(parts):
        sz = base + (1 if i < rem else 0)
        if sz > 0:
            pieces.append((s, sz))
            s += sz
    return pieces


def _identity_copy(x: jax.Array) -> jax.Array:
    """Materializing copy of x via chunked HBM->HBM DMAs (no VMEM round-trip)."""
    itemsize = jnp.dtype(x.dtype).itemsize
    nbytes = x.size * itemsize

    # Static chunk plan: one list of (start_row, num_rows) pieces (along axis 0)
    # per grid program; [None] means "whole array" (0-d inputs).
    if x.ndim == 0:
        plans = [[None]]
    else:
        dim0 = x.shape[0]
        total_pieces = min(_NCORES * _CHUNKS_PER_CORE, dim0,
                           max(1, nbytes // _MIN_CHUNK_BYTES))
        ncores = min(_NCORES, total_pieces)
        chunks_per_core = -(-total_pieces // ncores)          # ceil div
        plans = [_split(st, sz, chunks_per_core)
                 for st, sz in _split(0, dim0, ncores)]

    ncores = len(plans)
    max_chunks = max(len(p) for p in plans)

    def kernel(x_hbm, o_hbm, sem):
        pid = pl.program_id(0)
        for core, chunks in enumerate(plans):
            @pl.when(pid == core)
            def _issue(chunks=chunks):
                copies = []
                for j, piece in enumerate(chunks):
                    if piece is None:
                        src, dst = x_hbm, o_hbm
                    else:
                        st, sz = piece                      # static Python ints
                        src = x_hbm.at[pl.ds(st, sz)]
                        dst = o_hbm.at[pl.ds(st, sz)]
                    copies.append(pltpu.make_async_copy(src, dst, sem.at[j]))
                for cp in copies:        # issue all -> several DMAs in flight
                    cp.start()
                for cp in copies:
                    cp.wait()

    return pl.pallas_call(
        kernel,
        out_shape=jax.ShapeDtypeStruct(x.shape, x.dtype),
        grid=(ncores,),
        in_specs=[pl.BlockSpec(memory_space=pl.ANY)],       # input stays in HBM
        out_specs=pl.BlockSpec(memory_space=pl.ANY),        # output stays in HBM
        scratch_shapes=[pltpu.SemaphoreType.DMA((max_chunks,))],
        compiler_params=pltpu.CompilerParams(
            dimension_semantics=("parallel",)),             # both v7x TCs issue DMAs
        cost_estimate=pl.CostEstimate(flops=0, transcendentals=0,
                                      bytes_accessed=2 * nbytes),
    )(x)


def identity(x: jax.Array, materialize: bool = True) -> jax.Array:
    """Pallas implementation of nn.Identity.forward (y = x).

    nn.Identity aliases its input, so the truly optimal implementation is to
    return `x` unchanged (zero HBM traffic) -- pass materialize=False for that.
    With materialize=True (default here, so the Pallas kernel is the exercised
    path) a fresh buffer equal to x is produced via chunked HBM->HBM DMA.
    """
    if not materialize or x.size == 0:
        return x
    return _identity_copy(x)


if __name__ == "__main__":
    key = jax.random.PRNGKey(0)
    k0, k1 = jax.random.split(key)

    # Small NCHW-like input consistent with typical usage of Identity.
    x = jax.random.normal(k0, (2, 4, 16, 16), dtype=jnp.float32)
    y = identity(x)                       # tiny input -> single-DMA plan
    jax.block_until_ready(y)
    assert y.shape == x.shape and y.dtype == x.dtype
    assert bool(jnp.all(y == x))

    # Slightly larger input to exercise the chunked / dual-core DMA plan.
    x2 = jax.random.normal(k1, (16, 128, 128), dtype=jnp.float32)   # 1 MiB
    y2 = identity(x2)
    jax.block_until_ready(y2)
    assert y2.shape == x2.shape and y2.dtype == x2.dtype
    assert bool(jnp.all(y2 == x2))

    # Zero-copy semantic path (true Identity aliasing).
    assert identity(x, materialize=False) is x

    print("KERNEL_OK")
</pallas_src>

<mosaic_0001>
module attributes {stable_mosaic.version = 11 : i64} {
  func.func @kernel(%arg0: i32, %arg1: memref<2x4x16x16xf32, #tpu.memory_space<any>>, %arg2: memref<2x4x16x16xf32, #tpu.memory_space<any>>, %arg3: memref<1x!tpu.dma_semaphore, #tpu.memory_space<semaphore_mem>>) attributes {dimension_semantics = [#tpu.dimension_semantics<parallel>], iteration_bounds = array<i64: 1>, scalar_prefetch = 0 : i64, scratch_operands = 1 : i64, tpu.core_type = #tpu.core_type<tc>, window_params = [{}, {}]} {
    %c0_i32 = arith.constant 0 : i32
    %0 = arith.cmpi eq, %arg0, %c0_i32 : i32
    %1 = arith.extui %0 : i1 to i32
    %c0_i32_0 = arith.constant 0 : i32
    %2 = arith.cmpi ne, %1, %c0_i32_0 : i32
    scf.if %2 {
      %c0_i32_1 = arith.constant 0 : i32
      %c0_i32_2 = arith.constant 0 : i32
      %c0_i32_3 = arith.constant 0 : i32
      %c0_i32_4 = arith.constant 0 : i32
      %c0_i32_5 = arith.constant 0 : i32
      %3 = tpu.memref_slice %arg1[%c0_i32_2, %c0_i32_3, %c0_i32_4, %c0_i32_5] : memref<2x4x16x16xf32, #tpu.memory_space<any>> -> memref<2x4x16x16xf32, #tpu.memory_space<any>>
      %c0_i32_6 = arith.constant 0 : i32
      %c0_i32_7 = arith.constant 0 : i32
      %c0_i32_8 = arith.constant 0 : i32
      %c0_i32_9 = arith.constant 0 : i32
      %4 = tpu.memref_slice %arg2[%c0_i32_6, %c0_i32_7, %c0_i32_8, %c0_i32_9] : memref<2x4x16x16xf32, #tpu.memory_space<any>> -> memref<2x4x16x16xf32, #tpu.memory_space<any>>
      %5 = tpu.memref_slice %arg3[%c0_i32_1] : memref<1x!tpu.dma_semaphore, #tpu.memory_space<semaphore_mem>> -> memref<1x!tpu.dma_semaphore, #tpu.memory_space<semaphore_mem>>
      %6 = tpu.memref_squeeze %5 : memref<1x!tpu.dma_semaphore, #tpu.memory_space<semaphore_mem>> -> memref<!tpu.dma_semaphore, #tpu.memory_space<semaphore_mem>>
      tpu.enqueue_dma source(%3 : memref<2x4x16x16xf32, #tpu.memory_space<any>>) target(%4 : memref<2x4x16x16xf32, #tpu.memory_space<any>>) target_semaphore(%6 : memref<!tpu.dma_semaphore, #tpu.memory_space<semaphore_mem>>)
      %c0_i32_10 = arith.constant 0 : i32
      %c0_i32_11 = arith.constant 0 : i32
      %c0_i32_12 = arith.constant 0 : i32
      %c0_i32_13 = arith.constant 0 : i32
      %c0_i32_14 = arith.constant 0 : i32
      %7 = tpu.memref_slice %arg1[%c0_i32_11, %c0_i32_12, %c0_i32_13, %c0_i32_14] : memref<2x4x16x16xf32, #tpu.memory_space<any>> -> memref<2x4x16x16xf32, #tpu.memory_space<any>>
      %c0_i32_15 = arith.constant 0 : i32
      %c0_i32_16 = arith.constant 0 : i32
      %c0_i32_17 = arith.constant 0 : i32
      %c0_i32_18 = arith.constant 0 : i32
      %8 = tpu.memref_slice %arg2[%c0_i32_15, %c0_i32_16, %c0_i32_17, %c0_i32_18] : memref<2x4x16x16xf32, #tpu.memory_space<any>> -> memref<2x4x16x16xf32, #tpu.memory_space<any>>
      %9 = tpu.memref_slice %arg3[%c0_i32_10] : memref<1x!tpu.dma_semaphore, #tpu.memory_space<semaphore_mem>> -> memref<1x!tpu.dma_semaphore, #tpu.memory_space<semaphore_mem>>
      %10 = tpu.memref_squeeze %9 : memref<1x!tpu.dma_semaphore, #tpu.memory_space<semaphore_mem>> -> memref<!tpu.dma_semaphore, #tpu.memory_space<semaphore_mem>>
      tpu.wait_dma2 semaphore(%10 : memref<!tpu.dma_semaphore, #tpu.memory_space<semaphore_mem>>) src(%7 : memref<2x4x16x16xf32, #tpu.memory_space<any>>) dst(%8 : memref<2x4x16x16xf32, #tpu.memory_space<any>>)
    } else {
    }
    return
  }
}

</mosaic_0001>

<bundles_post_ra>
// kernel: tpu_custom_call.1
= control target key start
LH: loop header
LB: loop body
LE: loop exit
PB: predicated region body
PF: predicated region fallthrough
CT: control target
= control target key end

     0   :  { %s40_s6 = smov [#allocation2]   ;;  %s41_s7 = smov [#allocation3]   ;;  %s59_s0 = inlined_call_operand.hbm [shape: f32[2,4,16,16], index: 0, kind: input, shape index: {}]   ;;  %s60_s1 = inlined_call_operand.hbm [shape: f32[2,4,16,16], index: 1, kind: output, shape index: {}]  }
   0x1   :  { %s42_s8 = smov 0  }
   0x2   :  { %22 = dma.general %s59_s0, 2048, %s60_s1, %s40_s6, %s41_s7, [#allocation4], %s42_s8, 0  }
   0x3   :  { %38 = dma.done.wait [#allocation2], 2048 }
   0x4   :  { %39 = vsyncadd [#allocation2], 4294965248 }
   0x5   :  { %28 = vsyncmov [#allocation2] }
   0x8   :  { %s29_s13 = vpop.sfrf %28 }
   0x9   :  { %p34_p0 = scmp.ne.s32.totalorder %s29_s13, 0 }
   0xb   :  { %33 = shalt.err (%p34_p0)  }

</bundles_post_ra>
